<compile_context>
chip_gen: v6e
topology: v6e:2x2x1
jax: 0.10.0
libtpu: 0.0.40
codegen_flags: <defaults>
</compile_context>

<pallas_src>
import jax
import jax.numpy as jnp
from jax.experimental import pallas as pl
from jax.experimental.pallas import tpu as pltpu

# ---------------------------------------------------------------------------
# Small synthetic CLIP config
# ---------------------------------------------------------------------------
B = 4                      # batch size
C = 3                      # image channels
H = W = 16                 # image spatial size
P = 8                      # patch size
NP = (H // P) * (W // P)   # patches per image = 4
CPP = C * P * P            # flattened patch dim = 192
CPP_PAD = 256              # K padded to a multiple of 128 (unmasked loads)
D = 64                     # encoder width
E = 32                     # shared embedding dim
V = 64                     # text vocab size
L = 8                      # caption length
NL = 8                     # number of label prompts
NL_PAD = 128               # labels padded -> lane-dense (B, 128) similarity output


def _dot_t(a, b):
    # a @ b.T without materializing the transpose (contract the last dims).
    return jax.lax.dot_general(a, b, (((1,), (1,)), ((), ())),
                               preferred_element_type=jnp.float32)


# ---------------------------------------------------------------------------
# Fused forward kernel
# ---------------------------------------------------------------------------
def _clip_fused_kernel(scale_ref,      # SMEM (1,)          exp(logit_scale)
                       patches_ref,    # VMEM (B*NP, CPP_PAD)
                       wpatch_ref,     # VMEM (CPP_PAD, D)
                       bpatch_ref,     # VMEM (1, D)
                       pool_ref,       # VMEM (B, B*NP)      patch mean-pool matrix
                       capoh_ref,      # VMEM (B, V)         one-hot-mean of captions
                       laboh_ref,      # VMEM (NL_PAD, V)    one-hot-mean of labels
                       tokemb_ref,     # VMEM (V, D)
                       wimg_ref,       # VMEM (D, E)
                       wtxt_ref,       # VMEM (D, E)
                       sim_ref,        # VMEM (B, NL_PAD)    padded dot_similarity
                       loss_ref):      # VMEM (1, 1)         contrastive loss
    f32 = jnp.float32
    scale = scale_ref[0]

    # ---- image encoder: patch-embed matmul + bias, MXU mean-pool, projection
    hpatch = jnp.dot(patches_ref[...], wpatch_ref[...],
                     preferred_element_type=f32) + bpatch_ref[...]          # [B*NP, D]
    img_pool = jnp.dot(pool_ref[...], hpatch, preferred_element_type=f32)   # [B, D]
    img_emb = jnp.dot(img_pool, wimg_ref[...], preferred_element_type=f32)  # [B, E]

    # ---- text encoder: mean over tokens folded into the one-hot-mean matmul
    txt_pool = jnp.dot(capoh_ref[...], tokemb_ref[...],
                       preferred_element_type=f32)                          # [B, D]
    lab_pool = jnp.dot(laboh_ref[...], tokemb_ref[...],
                       preferred_element_type=f32)                          # [NL_PAD, D]
    txt_emb = jnp.dot(txt_pool, wtxt_ref[...], preferred_element_type=f32)  # [B, E]
    lab_emb = jnp.dot(lab_pool, wtxt_ref[...], preferred_element_type=f32)  # [NL_PAD, E]

    def l2norm(x):
        ss = jnp.sum(x * x, axis=-1, keepdims=True)
        return x * jax.lax.rsqrt(jnp.maximum(ss, 1e-24))  # eps: padded zero rows stay 0

    img_n = l2norm(img_emb)             # [B, E]
    txt_n = l2norm(txt_emb)             # [B, E]
    lab_n = l2norm(lab_emb)             # [NL_PAD, E] (rows >= NL stay exactly 0)

    img_s = scale * img_n               # fold logit scale once (used by sim AND logits)

    # dot_similarity = logit_scale * image_n @ label_n.T  (lane-dense padded slab)
    sim_ref[...] = _dot_t(img_s, lab_n)                                     # [B, NL_PAD]

    # ---- CLIP contrastive loss (world_size == 1: logits_per_text == logits.T,
    #      computed via axis-0 reductions instead of an explicit transpose)
    logits = _dot_t(img_s, txt_n)                                           # [B, B]
    bsz = logits.shape[0]
    row = jax.lax.broadcasted_iota(jnp.int32, (bsz, bsz), 0)
    col = jax.lax.broadcasted_iota(jnp.int32, (bsz, bsz), 1)
    diag = jnp.where(row == col, logits, 0.0)

    m_r = jnp.max(logits, axis=1, keepdims=True)                            # [B,1]
    lse_r = m_r + jnp.log(jnp.sum(jnp.exp(logits - m_r), axis=1, keepdims=True))
    m_c = jnp.max(logits, axis=0, keepdims=True)                            # [1,B]
    lse_c = m_c + jnp.log(jnp.sum(jnp.exp(logits - m_c), axis=0, keepdims=True))
    diag_r = jnp.sum(diag, axis=1, keepdims=True)                           # logits[i,i]
    diag_c = jnp.sum(diag, axis=0, keepdims=True)

    per_i = lse_r - diag_r                                                  # [B,1]
    per_t = lse_c - diag_c                                                  # [1,B]
    loss = 0.5 * (jnp.sum(per_i, axis=0, keepdims=True) / bsz +
                  jnp.sum(per_t, axis=1, keepdims=True) / bsz)              # [1,1]
    loss_ref[...] = loss


def clip_fused_call(scale, patches, w_patch, b_patch, pool_mat, cap_oh, lab_oh,
                    tok_emb, w_img, w_txt):
    vmem = pl.BlockSpec(memory_space=pltpu.MemorySpace.VMEM)
    smem = pl.BlockSpec(memory_space=pltpu.MemorySpace.SMEM)
    return pl.pallas_call(
        _clip_fused_kernel,
        out_shape=(
            jax.ShapeDtypeStruct((B, NL_PAD), jnp.float32),   # padded dot_similarity
            jax.ShapeDtypeStruct((1, 1), jnp.float32),        # contrastive loss
        ),
        in_specs=[
            smem,   # exp(logit_scale)
            vmem,   # patches
            vmem,   # W_patch
            vmem,   # b_patch
            vmem,   # pool matrix
            vmem,   # caption one-hot-mean
            vmem,   # label one-hot-mean (padded)
            vmem,   # tok_emb
            vmem,   # W_img
            vmem,   # W_txt
        ],
        out_specs=(vmem, vmem),
    )(scale, patches, w_patch, b_patch, pool_mat, cap_oh, lab_oh,
      tok_emb, w_img, w_txt)


# ---------------------------------------------------------------------------
# JAX glue (layout-only)
# ---------------------------------------------------------------------------
def _extract_patches(image):
    # NCHW -> [B*NP, C*P*P] with flatten order (c, p, q), zero-padded K -> CPP_PAD
    bsz, c, h, w = image.shape
    x = image.reshape(bsz, c, h // P, P, w // P, P)
    x = x.transpose(0, 2, 4, 1, 3, 5).reshape(bsz * (h // P) * (w // P), c * P * P)
    return jnp.pad(x, ((0, 0), (0, CPP_PAD - CPP)))


def _tokens_to_pool_onehot(tokens):
    # mean over sequence commutes with the (linear) embedding lookup:
    # mean_l(tok_emb[tokens]) == one_hot(tokens).mean(axis=1) @ tok_emb
    return jax.nn.one_hot(tokens, V, dtype=jnp.float32).mean(axis=1)


def openai_clip_forward(params, batch, encoded_labels):
    patches = _extract_patches(batch["image"])                 # [B*NP, CPP_PAD]
    cap_oh = _tokens_to_pool_onehot(batch["caption"])          # [B, V]
    lab_oh = _tokens_to_pool_onehot(encoded_labels)            # [NL, V]
    lab_oh = jnp.pad(lab_oh, ((0, NL_PAD - NL), (0, 0)))       # lane-dense labels

    # mean-pool over the NP patches of each image, expressed as an MXU matmul
    pool_mat = jnp.repeat(jnp.eye(B, dtype=jnp.float32), NP, axis=1) / NP   # [B, B*NP]

    scale = jnp.exp(params["logit_scale"]).reshape(1).astype(jnp.float32)

    sim_pad, loss = clip_fused_call(
        scale, patches, params["W_patch"], params["b_patch"][None, :],
        pool_mat, cap_oh, lab_oh, params["tok_emb"], params["W_img"],
        params["W_txt"])

    # label_one_hot is only consumed by the ASL loss, which is not configured here
    # (config.loss_function == ['clip']).
    return loss[0, 0], sim_pad[:, :NL]


# ---------------------------------------------------------------------------
# Pure-JAX reference (same math, no Pallas) for a sanity check
# ---------------------------------------------------------------------------
def reference_forward(params, batch, encoded_labels):
    hi = jax.lax.Precision.HIGHEST

    def encode_image(img):
        x = img.reshape(B, C, H // P, P, W // P, P)
        x = x.transpose(0, 2, 4, 1, 3, 5).reshape(B, NP, CPP)
        h = jnp.einsum("bpk,kd->bpd", x, params["W_patch"][:CPP], precision=hi)
        h = h + params["b_patch"]
        return jnp.dot(h.mean(axis=1), params["W_img"], precision=hi)

    def encode_text(tok):
        emb = params["tok_emb"][tok]                       # [N, L, D]
        return jnp.dot(emb.mean(axis=1), params["W_txt"], precision=hi)

    def l2n(x):
        return x / jnp.linalg.norm(x, axis=-1, keepdims=True)

    img = l2n(encode_image(batch["image"]))
    txt = l2n(encode_text(batch["caption"]))
    lab = l2n(encode_text(encoded_labels))
    scale = jnp.exp(params["logit_scale"])
    sim = scale * jnp.dot(img, lab.T, precision=hi)
    logits = scale * jnp.dot(img, txt.T, precision=hi)
    labels = jnp.arange(B)
    ce = lambda lg: jnp.mean(jax.nn.logsumexp(lg, axis=1) - lg[labels, labels])
    loss = 0.5 * (ce(logits) + ce(logits.T))
    return loss, sim


# ---------------------------------------------------------------------------
# Deterministic parameter / input construction
# ---------------------------------------------------------------------------
def make_params(key):
    ks = jax.random.split(key, 5)
    w_patch = 0.02 * jax.random.normal(ks[0], (CPP, D), jnp.float32)
    return {
        "W_patch": jnp.pad(w_patch, ((0, CPP_PAD - CPP), (0, 0))),  # zero-padded K
        "b_patch": jnp.zeros((D,), jnp.float32),
        "W_img": 0.02 * jax.random.normal(ks[1], (D, E), jnp.float32),
        "tok_emb": 0.02 * jax.random.normal(ks[2], (V, D), jnp.float32),
        "W_txt": 0.02 * jax.random.normal(ks[3], (D, E), jnp.float32),
        "logit_scale": jnp.asarray(jnp.log(1.0 / 0.07), jnp.float32),
    }


if __name__ == "__main__":
    root = jax.random.PRNGKey(0)
    kp, ki, kc, kl, ko = jax.random.split(root, 5)

    params = make_params(kp)
    batch = {
        "image": jax.random.normal(ki, (B, C, H, W), jnp.float32),
        "caption": jax.random.randint(kc, (B, L), 0, V, jnp.int32),
        # unused by the configured 'clip' loss, kept for interface fidelity
        "label_one_hot": (jax.random.uniform(ko, (B, NL)) < 0.2).astype(jnp.float32),
    }
    encoded_labels = jax.random.randint(kl, (NL, L), 0, V, jnp.int32)

    fwd = jax.jit(openai_clip_forward)
    loss, dot_similarity = fwd(params, batch, encoded_labels)
    jax.block_until_ready((loss, dot_similarity))

    assert dot_similarity.shape == (B, NL)
    assert bool(jnp.isfinite(loss)) and bool(jnp.all(jnp.isfinite(dot_similarity)))

    # sanity check against a pure-JAX reference (loose tol: MXU f32 multi-pass)
    ref_loss, ref_sim = jax.jit(reference_forward)(params, batch, encoded_labels)
    assert jnp.allclose(dot_similarity, ref_sim, rtol=2e-2, atol=2e-2)
    assert jnp.allclose(loss, ref_loss, rtol=2e-2, atol=2e-2)

    print("KERNEL_OK")
</pallas_src>

<mosaic_0001>
module attributes {stable_mosaic.version = 11 : i64} {
  func.func @_clip_fused_kernel(%arg0: memref<1xf32, #tpu.memory_space<smem>>, %arg1: memref<16x256xf32, #tpu.memory_space<vmem>>, %arg2: memref<256x64xf32, #tpu.memory_space<vmem>>, %arg3: memref<1x64xf32, #tpu.memory_space<vmem>>, %arg4: memref<4x16xf32, #tpu.memory_space<vmem>>, %arg5: memref<4x64xf32, #tpu.memory_space<vmem>>, %arg6: memref<128x64xf32, #tpu.memory_space<vmem>>, %arg7: memref<64x64xf32, #tpu.memory_space<vmem>>, %arg8: memref<64x32xf32, #tpu.memory_space<vmem>>, %arg9: memref<64x32xf32, #tpu.memory_space<vmem>>, %arg10: memref<4x128xf32, #tpu.memory_space<vmem>>, %arg11: memref<1x1xf32, #tpu.memory_space<vmem>>) attributes {dimension_semantics = [], scalar_prefetch = 0 : i64, scratch_operands = 0 : i64, tpu.core_type = #tpu.core_type<tc>} {
    %c0 = arith.constant 0 : index
    %0 = memref.load %arg0[%c0] : memref<1xf32, #tpu.memory_space<smem>>
    %c0_0 = arith.constant 0 : index
    %c0_1 = arith.constant 0 : index
    %1 = vector.load %arg1[%c0_0, %c0_1] : memref<16x256xf32, #tpu.memory_space<vmem>>, vector<16x256xf32>
    %c0_2 = arith.constant 0 : index
    %c0_3 = arith.constant 0 : index
    %2 = vector.load %arg2[%c0_2, %c0_3] : memref<256x64xf32, #tpu.memory_space<vmem>>, vector<256x64xf32>
    %cst = arith.constant dense<0.000000e+00> : vector<16x64xf32>
    %3 = tpu.matmul %1, %2, %cst {dimension_numbers = #tpu.dot_dimension_numbers<[1], [0], [0], [1], [0, 0, 1, 1], [], []>} : vector<16x256xf32>, vector<256x64xf32>, vector<16x64xf32> -> vector<16x64xf32>
    %c0_4 = arith.constant 0 : index
    %c0_5 = arith.constant 0 : index
    %4 = vector.load %arg3[%c0_4, %c0_5] : memref<1x64xf32, #tpu.memory_space<vmem>>, vector<1x64xf32>
    %5 = vector.broadcast %4 : vector<1x64xf32> to vector<16x64xf32>
    %6 = arith.addf %3, %5 : vector<16x64xf32>
    %c0_6 = arith.constant 0 : index
    %c0_7 = arith.constant 0 : index
    %7 = vector.load %arg4[%c0_6, %c0_7] : memref<4x16xf32, #tpu.memory_space<vmem>>, vector<4x16xf32>
    %cst_8 = arith.constant dense<0.000000e+00> : vector<4x64xf32>
    %8 = tpu.matmul %7, %6, %cst_8 {dimension_numbers = #tpu.dot_dimension_numbers<[1], [0], [0], [1], [0, 0, 1, 1], [], []>} : vector<4x16xf32>, vector<16x64xf32>, vector<4x64xf32> -> vector<4x64xf32>
    %c0_9 = arith.constant 0 : index
    %c0_10 = arith.constant 0 : index
    %9 = vector.load %arg8[%c0_9, %c0_10] : memref<64x32xf32, #tpu.memory_space<vmem>>, vector<64x32xf32>
    %cst_11 = arith.constant dense<0.000000e+00> : vector<4x32xf32>
    %10 = tpu.matmul %8, %9, %cst_11 {dimension_numbers = #tpu.dot_dimension_numbers<[1], [0], [0], [1], [0, 0, 1, 1], [], []>} : vector<4x64xf32>, vector<64x32xf32>, vector<4x32xf32> -> vector<4x32xf32>
    %c0_12 = arith.constant 0 : index
    %c0_13 = arith.constant 0 : index
    %11 = vector.load %arg5[%c0_12, %c0_13] : memref<4x64xf32, #tpu.memory_space<vmem>>, vector<4x64xf32>
    %c0_14 = arith.constant 0 : index
    %c0_15 = arith.constant 0 : index
    %12 = vector.load %arg7[%c0_14, %c0_15] : memref<64x64xf32, #tpu.memory_space<vmem>>, vector<64x64xf32>
    %cst_16 = arith.constant dense<0.000000e+00> : vector<4x64xf32>
    %13 = tpu.matmul %11, %12, %cst_16 {dimension_numbers = #tpu.dot_dimension_numbers<[1], [0], [0], [1], [0, 0, 1, 1], [], []>} : vector<4x64xf32>, vector<64x64xf32>, vector<4x64xf32> -> vector<4x64xf32>
    %c0_17 = arith.constant 0 : index
    %c0_18 = arith.constant 0 : index
    %14 = vector.load %arg6[%c0_17, %c0_18] : memref<128x64xf32, #tpu.memory_space<vmem>>, vector<128x64xf32>
    %c0_19 = arith.constant 0 : index
    %c0_20 = arith.constant 0 : index
    %15 = vector.load %arg7[%c0_19, %c0_20] : memref<64x64xf32, #tpu.memory_space<vmem>>, vector<64x64xf32>
    %cst_21 = arith.constant dense<0.000000e+00> : vector<128x64xf32>
    %16 = tpu.matmul %14, %15, %cst_21 {dimension_numbers = #tpu.dot_dimension_numbers<[1], [0], [0], [1], [0, 0, 1, 1], [], []>} : vector<128x64xf32>, vector<64x64xf32>, vector<128x64xf32> -> vector<128x64xf32>
    %c0_22 = arith.constant 0 : index
    %c0_23 = arith.constant 0 : index
    %17 = vector.load %arg9[%c0_22, %c0_23] : memref<64x32xf32, #tpu.memory_space<vmem>>, vector<64x32xf32>
    %cst_24 = arith.constant dense<0.000000e+00> : vector<4x32xf32>
    %18 = tpu.matmul %13, %17, %cst_24 {dimension_numbers = #tpu.dot_dimension_numbers<[1], [0], [0], [1], [0, 0, 1, 1], [], []>} : vector<4x64xf32>, vector<64x32xf32>, vector<4x32xf32> -> vector<4x32xf32>
    %c0_25 = arith.constant 0 : index
    %c0_26 = arith.constant 0 : index
    %19 = vector.load %arg9[%c0_25, %c0_26] : memref<64x32xf32, #tpu.memory_space<vmem>>, vector<64x32xf32>
    %cst_27 = arith.constant dense<0.000000e+00> : vector<128x32xf32>
    %20 = tpu.matmul %16, %19, %cst_27 {dimension_numbers = #tpu.dot_dimension_numbers<[1], [0], [0], [1], [0, 0, 1, 1], [], []>} : vector<128x64xf32>, vector<64x32xf32>, vector<128x32xf32> -> vector<128x32xf32>
    %21 = arith.mulf %10, %10 : vector<4x32xf32>
    %cst_28 = arith.constant dense<0.000000e+00> : vector<4xf32>
    %22 = vector.multi_reduction <add>, %21, %cst_28 [1] : vector<4x32xf32> to vector<4xf32>
    %23 = vector.shape_cast %22 : vector<4xf32> to vector<4x1xf32>
    %cst_29 = arith.constant 1.000000e-24 : f32
    %24 = vector.broadcast %cst_29 : f32 to vector<4x1xf32>
    %25 = arith.maximumf %23, %24 : vector<4x1xf32>
    %26 = math.rsqrt %25 : vector<4x1xf32>
    %27 = vector.broadcast %26 : vector<4x1xf32> to vector<4x32xf32>
    %28 = arith.mulf %10, %27 : vector<4x32xf32>
    %29 = arith.mulf %18, %18 : vector<4x32xf32>
    %cst_30 = arith.constant dense<0.000000e+00> : vector<4xf32>
    %30 = vector.multi_reduction <add>, %29, %cst_30 [1] : vector<4x32xf32> to vector<4xf32>
    %31 = vector.shape_cast %30 : vector<4xf32> to vector<4x1xf32>
    %cst_31 = arith.constant 1.000000e-24 : f32
    %32 = vector.broadcast %cst_31 : f32 to vector<4x1xf32>
    %33 = arith.maximumf %31, %32 : vector<4x1xf32>
    %34 = math.rsqrt %33 : vector<4x1xf32>
    %35 = vector.broadcast %34 : vector<4x1xf32> to vector<4x32xf32>
    %36 = arith.mulf %18, %35 : vector<4x32xf32>
    %37 = arith.mulf %20, %20 : vector<128x32xf32>
    %cst_32 = arith.constant dense<0.000000e+00> : vector<128xf32>
    %38 = vector.multi_reduction <add>, %37, %cst_32 [1] : vector<128x32xf32> to vector<128xf32>
    %39 = vector.shape_cast %38 : vector<128xf32> to vector<128x1xf32>
    %cst_33 = arith.constant 1.000000e-24 : f32
    %40 = vector.broadcast %cst_33 : f32 to vector<128x1xf32>
    %41 = arith.maximumf %39, %40 : vector<128x1xf32>
    %42 = math.rsqrt %41 : vector<128x1xf32>
    %43 = vector.broadcast %42 : vector<128x1xf32> to vector<128x32xf32>
    %44 = arith.mulf %20, %43 : vector<128x32xf32>
    %45 = vector.broadcast %0 : f32 to vector<4x32xf32>
    %46 = arith.mulf %45, %28 : vector<4x32xf32>
    %cst_34 = arith.constant dense<0.000000e+00> : vector<4x128xf32>
    %47 = tpu.matmul %46, %44, %cst_34 {dimension_numbers = #tpu.dot_dimension_numbers<[1], [1], [0], [0], [0, 0, 1, 0], [], []>} : vector<4x32xf32>, vector<128x32xf32>, vector<4x128xf32> -> vector<4x128xf32>
    %c0_35 = arith.constant 0 : index
    %c0_36 = arith.constant 0 : index
    %48 = vector.load %arg10[%c0_35, %c0_36] : memref<4x128xf32, #tpu.memory_space<vmem>>, vector<4x128xf32>
    tpu.vector_store %arg10[%c0_35, %c0_36], %47 {strides = array<i32>} : memref<4x128xf32, #tpu.memory_space<vmem>>, vector<4x128xf32>,
    %cst_37 = arith.constant dense<0.000000e+00> : vector<4x4xf32>
    %49 = tpu.matmul %46, %36, %cst_37 {dimension_numbers = #tpu.dot_dimension_numbers<[1], [1], [0], [0], [0, 0, 1, 0], [], []>} : vector<4x32xf32>, vector<4x32xf32>, vector<4x4xf32> -> vector<4x4xf32>
    %50 = tpu.iota {dimensions = array<i32: 0>} : vector<4x4xi32>
    %51 = tpu.iota {dimensions = array<i32: 1>} : vector<4x4xi32>
    %52 = arith.cmpi eq, %50, %51 : vector<4x4xi32>
    %cst_38 = arith.constant 0.000000e+00 : f32
    %53 = vector.broadcast %cst_38 : f32 to vector<4x4xf32>
    %54 = arith.select %52, %49, %53 : vector<4x4xi1>, vector<4x4xf32>
    %cst_39 = arith.constant dense<0xFF800000> : vector<4xf32>
    %55 = vector.multi_reduction <maximumf>, %49, %cst_39 [1] : vector<4x4xf32> to vector<4xf32>
    %56 = vector.shape_cast %55 : vector<4xf32> to vector<4x1xf32>
    %57 = vector.broadcast %56 : vector<4x1xf32> to vector<4x4xf32>
    %58 = arith.subf %49, %57 : vector<4x4xf32>
    %59 = math.exp %58 : vector<4x4xf32>
    %cst_40 = arith.constant dense<0.000000e+00> : vector<4xf32>
    %60 = vector.multi_reduction <add>, %59, %cst_40 [1] : vector<4x4xf32> to vector<4xf32>
    %61 = vector.shape_cast %60 : vector<4xf32> to vector<4x1xf32>
    %62 = math.log %61 : vector<4x1xf32>
    %63 = arith.addf %56, %62 : vector<4x1xf32>
    %cst_41 = arith.constant dense<0xFF800000> : vector<4xf32>
    %64 = vector.multi_reduction <maximumf>, %49, %cst_41 [0] : vector<4x4xf32> to vector<4xf32>
    %65 = vector.shape_cast %64 : vector<4xf32> to vector<1x4xf32>
    %66 = vector.broadcast %65 : vector<1x4xf32> to vector<4x4xf32>
    %67 = arith.subf %49, %66 : vector<4x4xf32>
    %68 = math.exp %67 : vector<4x4xf32>
    %cst_42 = arith.constant dense<0.000000e+00> : vector<4xf32>
    %69 = vector.multi_reduction <add>, %68, %cst_42 [0] : vector<4x4xf32> to vector<4xf32>
    %70 = vector.shape_cast %69 : vector<4xf32> to vector<1x4xf32>
    %71 = math.log %70 : vector<1x4xf32>
    %72 = arith.addf %65, %71 : vector<1x4xf32>
    %cst_43 = arith.constant dense<0.000000e+00> : vector<4xf32>
    %73 = vector.multi_reduction <add>, %54, %cst_43 [1] : vector<4x4xf32> to vector<4xf32>
    %74 = vector.shape_cast %73 : vector<4xf32> to vector<4x1xf32>
    %cst_44 = arith.constant dense<0.000000e+00> : vector<4xf32>
    %75 = vector.multi_reduction <add>, %54, %cst_44 [0] : vector<4x4xf32> to vector<4xf32>
    %76 = vector.shape_cast %75 : vector<4xf32> to vector<1x4xf32>
    %77 = arith.subf %63, %74 : vector<4x1xf32>
    %78 = arith.subf %72, %76 : vector<1x4xf32>
    %cst_45 = arith.constant dense<0.000000e+00> : vector<1xf32>
    %79 = vector.multi_reduction <add>, %77, %cst_45 [0] : vector<4x1xf32> to vector<1xf32>
    %80 = vector.shape_cast %79 : vector<1xf32> to vector<1x1xf32>
    %cst_46 = arith.constant 4.000000e+00 : f32
    %81 = vector.broadcast %cst_46 : f32 to vector<1x1xf32>
    %82 = arith.divf %80, %81 : vector<1x1xf32>
    %cst_47 = arith.constant dense<0.000000e+00> : vector<1xf32>
    %83 = vector.multi_reduction <add>, %78, %cst_47 [1] : vector<1x4xf32> to vector<1xf32>
    %84 = vector.shape_cast %83 : vector<1xf32> to vector<1x1xf32>
    %cst_48 = arith.constant 4.000000e+00 : f32
    %85 = vector.broadcast %cst_48 : f32 to vector<1x1xf32>
    %86 = arith.divf %84, %85 : vector<1x1xf32>
    %87 = arith.addf %82, %86 : vector<1x1xf32>
    %cst_49 = arith.constant 5.000000e-01 : f32
    %88 = vector.broadcast %cst_49 : f32 to vector<1x1xf32>
    %89 = arith.mulf %88, %87 : vector<1x1xf32>
    %c0_50 = arith.constant 0 : index
    %c0_51 = arith.constant 0 : index
    %90 = vector.load %arg11[%c0_50, %c0_51] : memref<1x1xf32, #tpu.memory_space<vmem>>, vector<1x1xf32>
    tpu.vector_store %arg11[%c0_50, %c0_51], %89 {strides = array<i32>} : memref<1x1xf32, #tpu.memory_space<vmem>>, vector<1x1xf32>,
    return
  }
}

</mosaic_0001>

<bundles_post_ra>
// kernel: openai_clip_forward.1
= control target key start
LH: loop header
LB: loop body
LE: loop exit
PB: predicated region body
PF: predicated region fallthrough
CT: control target
= control target key end

     0   :  { %18 = vsyncpa [#allocation4], 0  ;;  %s2302_s0 = inlined_call_operand.<no memory space> [shape: f32[1], index: 0, kind: input, shape index: {}]   ;;  %s2303_s1 = inlined_call_operand.vmem [shape: f32[16,256], index: 1, kind: input, shape index: {}]   ;;  %s2304_s2 = inlined_call_operand.vmem [shape: f32[256,64], index: 2, kind: input, shape index: {}]   ;;  %s2305_s3 = inlined_call_operand.vmem [shape: f32[1,64], index: 3, kind: input, shape index: {}]   ;;  %s2306_s4 = inlined_call_operand.vmem [shape: f32[4,16], index: 4, kind: input, shape index: {}]   ;;  %s2307_s5 = inlined_call_operand.vmem [shape: f32[4,64], index: 5, kind: input, shape index: {}]   ;;  %s2308_s6 = inlined_call_operand.vmem [shape: f32[128,64], index: 6, kind: input, shape index: {}]   ;;  %s2309_s7 = inlined_call_operand.vmem [shape: f32[64,64], index: 7, kind: input, shape index: {}]   ;;  %s2310_s8 = inlined_call_operand.vmem [shape: f32[64,32], index: 8, kind: input, shape index: {}]   ;;  %s2311_s9 = inlined_call_operand.vmem [shape: f32[64,32], index: 9, kind: input, shape index: {}]   ;;  %s2312_s10 = inlined_call_operand.hbm [shape: f32[4,128], index: 10, kind: output, shape index: {0}]   ;;  %s2313_s11 = inlined_call_operand.hbm [shape: f32[1,1], index: 11, kind: output, shape index: {1}]  }
   0x1   :  { %v76_v0 = vld [vmem:[%s2304_s2 + $0xf8] sm:$0xff]  ;;  %v75_v2 = vld [vmem:[%s2304_s2 + $0xf0] sm:$0xff]  ;;  %v74_v4 = vld [vmem:[%s2304_s2 + $0xe8] sm:$0xff] }
   0x2   :  { %v60_v1 = vld [vmem:[%s2304_s2 + $0x78] sm:$0xff]  ;;  %1358 = vmatprep.subr.mxu0 %v76_v0  ;;  %v59_v3 = vld [vmem:[%s2304_s2 + $0x70] sm:$0xff]  ;;  %v58_v5 = vld [vmem:[%s2304_s2 + $0x68] sm:$0xff] }
   0x3   :  { %1359 = vmatpush3.msra.mxu0 %v60_v1  ;;  %v73_v6 = vld [vmem:[%s2304_s2 + $0xe0] sm:$0xff]  ;;  %v72_v8 = vld [vmem:[%s2304_s2 + $0xd8] sm:$0xff]  ;;  %v71_v10 = vld [vmem:[%s2304_s2 + $0xd0] sm:$0xff] }
   0x4   :  { %1360 = vmatprep.subr.mxu0 %v75_v2  ;;  %v57_v7 = vld [vmem:[%s2304_s2 + $0x60] sm:$0xff]  ;;  %v56_v9 = vld [vmem:[%s2304_s2 + $0x58] sm:$0xff]  ;;  %v55_v11 = vld [vmem:[%s2304_s2 + $0x50] sm:$0xff] }
   0x5   :  { %1361 = vmatpush3.msra.mxu0 %v59_v3  ;;  %v70_v12 = vld [vmem:[%s2304_s2 + $0xc8] sm:$0xff]  ;;  %v69_v15 = vld [vmem:[%s2304_s2 + $0xc0] sm:$0xff] }
   0x6   :  { %1362 = vmatprep.subr.mxu0 %v74_v4  ;;  %v42_v13 = vld [vmem:[%s2303_s1 + $0x8] sm:$0xff] }
   0x7   :  { %1363 = vmatpush3.msra.mxu0 %v58_v5  ;;  %v54_v14 = vld [vmem:[%s2304_s2 + $0x48] sm:$0xff]  ;;  %148 = vmatprep.mubr.f32.mxu0 %v42_v13 }
   0x8   :  { %1364 = vmatprep.subr.mxu0 %v73_v6 }
   0x9   :  { %1365 = vmatpush3.msra.mxu0 %v57_v7 }
   0xa   :  { %1366 = vmatprep.subr.mxu0 %v72_v8 }
   0xb   :  { %1367 = vmatpush3.msra.mxu0 %v56_v9 }
   0xc   :  { %1368 = vmatprep.subr.mxu0 %v71_v10 }
   0xd   :  { %1369 = vmatpush3.msra.mxu0 %v55_v11 }
   0xe   :  { %19 = vsyncpa [#allocation6], 0  ;;  %1370 = vmatprep.subr.mxu0 %v70_v12  ;;  %v53_v16 = vld [vmem:[%s2304_s2 + $0x40] sm:$0xff]  ;;  %v68_v17 = vld [vmem:[%s2304_s2 + $0xb8] sm:$0xff]  ;;  %v1769_v36 = vmov 0.0   ;;  %vm1770_vm0 = vmmov 0  }
   0xf   :  { %1371 = vmatpush3.msra.mxu0 %v54_v14  ;;  %v52_v18 = vld [vmem:[%s2304_s2 + $0x38] sm:$0xff]  ;;  %v67_v19 = vld [vmem:[%s2304_s2 + $0xb0] sm:$0xff]  ;;  %v66_v21 = vld [vmem:[%s2304_s2 + $0xa8] sm:$0xff]  ;;  %1493 = vmatprep.subr.mxu1 %v1769_v36  ;;  %vm160_vm1 = vcmask 130048   ;;  %vm242_vm2 = vcmask 523264   ;;  %vm882_vm3 = vcmask 257024  }
  0x10   :  { %1372 = vmatprep.subr.mxu0 %v69_v15  ;;  %v51_v20 = vld [vmem:[%s2304_s2 + $0x30] sm:$0xff]  ;;  %v50_v22 = vld [vmem:[%s2304_s2 + $0x28] sm:$0xff]  ;;  %v65_v23 = vld [vmem:[%s2304_s2 + $0xa0] sm:$0xff]  ;;  %1497 = vmatprep.mubr.msk.f32.mxu1 %vm1770_vm0, %v1769_v36  ;;  %vm912_vm4 = vcmask 261120   ;;  %vm1212_vm5 = vcmask 27648   ;;  %vm1265_vm7 = vcmask 31744  }
  0x11   :  { %1373 = vmatpush3.msra.mxu0 %v53_v16  ;;  %v49_v24 = vld [vmem:[%s2304_s2 + $0x20] sm:$0xff]  ;;  %v64_v25 = vld [vmem:[%s2304_s2 + $0x98] sm:$0xff]  ;;  %v63_v27 = vld [vmem:[%s2304_s2 + $0x90] sm:$0xff] }
  0x12   :  { %1374 = vmatprep.subr.mxu0 %v68_v17  ;;  %v48_v26 = vld [vmem:[%s2304_s2 + $0x18] sm:$0xff]  ;;  %v47_v28 = vld [vmem:[%s2304_s2 + $0x10] sm:$0xff]  ;;  %v62_v29 = vld [vmem:[%s2304_s2 + $0x88] sm:$0xff] }
  0x13   :  { %1375 = vmatpush3.msra.mxu0 %v52_v18  ;;  %v46_v30 = vld [vmem:[%s2304_s2 + $0x8] sm:$0xff]  ;;  %v61_v31 = vld [vmem:[%s2304_s2 + $0x80] sm:$0xff]  ;;  %v44_v34 = vld [vmem:[%s2303_s1 + $0x18] sm:$0xff] }
  0x14   :  { %1376 = vmatprep.subr.mxu0 %v67_v19  ;;  %v45_v32 = vld [vmem:[%s2304_s2] sm:$0xff]  ;;  %v43_v35 = vld [vmem:[%s2303_s1 + $0x10] sm:$0xff]  ;;  %v241_v47 = vld [vmem:[%s2310_s8 + $0x38] sm:$0xff] }
  0x15   :  { %1377 = vmatpush3.msra.mxu0 %v51_v20  ;;  %v41_v33 = vld [vmem:[%s2303_s1] sm:$0xff]  ;;  %v240_v48 = vld [vmem:[%s2310_s8 + $0x30] sm:$0xff]  ;;  %v239_v49 = vld [vmem:[%s2310_s8 + $0x28] sm:$0xff] }
  0x16   :  { %1378 = vmatprep.subr.mxu0 %v66_v21  ;;  %v1302_v43 = vld [vmem:[%s2305_s3] ss:$0 sm:$0xff]  ;;  %v237_v51 = vld [vmem:[%s2310_s8 + $0x18] sm:$0xff]  ;;  %v236_v52 = vld [vmem:[%s2310_s8 + $0x10] sm:$0xff] }
  0x17   :  { %1379 = vmatpush3.msra.mxu0 %v50_v22  ;;  %v159_v46 = vld [vmem:[%s2306_s4] sm:$0xf]  ;;  %v235_v53 = vld [vmem:[%s2310_s8 + $0x8] sm:$0xff]  ;;  %v324_v55 = vld [vmem:[%s2309_s7 + $0x38] sm:$0xff] }
  0x18   :  { %1380 = vmatprep.subr.mxu0 %v65_v23  ;;  %v238_v50 = vld [vmem:[%s2310_s8 + $0x20] sm:$0xff]  ;;  %v323_v56 = vld [vmem:[%s2309_s7 + $0x30] sm:$0xff]  ;;  %v322_v57 = vld [vmem:[%s2309_s7 + $0x28] sm:$0xff] }
  0x19   :  { %1381 = vmatpush3.msra.mxu0 %v49_v24  ;;  %v234_v54 = vld [vmem:[%s2310_s8] sm:$0xff]  ;;  %v320_v59 = vld [vmem:[%s2309_s7 + $0x18] sm:$0xff]  ;;  %v319_v60 = vld [vmem:[%s2309_s7 + $0x10] sm:$0xff] }
  0x1a   :  { %1382 = vmatprep.subr.mxu0 %v64_v25  ;;  %v321_v58 = vld [vmem:[%s2309_s7 + $0x20] sm:$0xff]  ;;  %v318_v61 = vld [vmem:[%s2309_s7 + $0x8] sm:$0xff]  ;;  %v400_v1 = vld [vmem:[%s2308_s6 + $0x10] sm:$0xff] }
  0x1b   :  { %1383 = vmatpush3.msra.mxu0 %v48_v26  ;;  %v317_v62 = vld [vmem:[%s2309_s7] sm:$0xff]  ;;  %v399_v0 = vld [vmem:[%s2308_s6 + $0x8] sm:$0xff]  ;;  %v401_v2 = vld [vmem:[%s2308_s6 + $0x18] sm:$0xff] }
  0x1c   :  { %1384 = vmatprep.subr.mxu0 %v63_v27  ;;  %v398_v63 = vld [vmem:[%s2308_s6] sm:$0xff]  ;;  %v403_v4 = vld [vmem:[%s2308_s6 + $0x28] sm:$0xff]  ;;  %v404_v5 = vld [vmem:[%s2308_s6 + $0x30] sm:$0xff] }
  0x1d   :  { %1385 = vmatpush3.msra.mxu0 %v47_v28  ;;  %v402_v3 = vld [vmem:[%s2308_s6 + $0x20] sm:$0xff]  ;;  %v405_v6 = vld [vmem:[%s2308_s6 + $0x38] sm:$0xff]  ;;  %v407_v8 = vld [vmem:[%s2308_s6 + $0x48] sm:$0xff] }
  0x1e   :  { %1386 = vmatprep.subr.mxu0 %v62_v29  ;;  %v406_v7 = vld [vmem:[%s2308_s6 + $0x40] sm:$0xff]  ;;  %v408_v9 = vld [vmem:[%s2308_s6 + $0x50] sm:$0xff]  ;;  %v409_v10 = vld [vmem:[%s2308_s6 + $0x58] sm:$0xff] }
  0x1f   :  { %1387 = vmatpush3.msra.mxu0 %v46_v30  ;;  %v410_v11 = vld [vmem:[%s2308_s6 + $0x60] sm:$0xff]  ;;  %v411_v12 = vld [vmem:[%s2308_s6 + $0x68] sm:$0xff]  ;;  %v412_v13 = vld [vmem:[%s2308_s6 + $0x70] sm:$0xff] }
  0x20   :  { %1388 = vmatprep.subr.mxu0 %v61_v31  ;;  %v413_v14 = vld [vmem:[%s2308_s6 + $0x78] sm:$0xff]  ;;  %v316_v17 = vld [vmem:[%s2307_s5] sm:$0xf]  ;;  %v613_v19 = vld [vmem:[%s2311_s9 + $0x30] sm:$0xff] }
  0x21   :  { %1389 = vmatpush3.msra.mxu0 %v45_v32  ;;  %v614_v18 = vld [vmem:[%s2311_s9 + $0x38] sm:$0xff]  ;;  %v612_v20 = vld [vmem:[%s2311_s9 + $0x28] sm:$0xff]  ;;  %v611_v21 = vld [vmem:[%s2311_s9 + $0x20] sm:$0xff] }
  0x22   :  { %149 = vmatmul.mubr.f32.vlgmr.msra.gmra.mxu0 %v41_v33  ;;  %1538 = vmatprep.subr.mxu0 %v324_v55  ;;  %v610_v22 = vld [vmem:[%s2311_s9 + $0x18] sm:$0xff]  ;;  %v609_v23 = vld [vmem:[%s2311_s9 + $0x10] sm:$0xff]  ;;  %v608_v24 = vld [vmem:[%s2311_s9 + $0x8] sm:$0xff] }
  0x23   :  { %153 = vmatprep.mubr.f32.mxu0 %v44_v34  ;;  %1539 = vmatpush3.msra.mxu0 %v324_v55  ;;  %v607_v25 = vld [vmem:[%s2311_s9] sm:$0xff] }
  0x24   :  { %1540 = vmatprep.subr.mxu0 %v323_v56 }
  0x25   :  { %1541 = vmatpush3.msra.mxu0 %v323_v56 }
  0x26   :  { %154 = vmatmul.mubr.f32.gmra.mxu0 %v43_v35  ;;  %1542 = vmatprep.subr.mxu0 %v322_v57 }
  0x27   :  { %1543 = vmatpush3.msra.mxu0 %v322_v57  ;;  %1554 = vmatprep.mubr.msk.f32.mxu0 %vm242_vm2, %v398_v63 }
  0x28   :  { %1544 = vmatprep.subr.mxu0 %v321_v58 }
  0x29   :  { %1545 = vmatpush3.msra.mxu0 %v321_v58 }
  0x2a   :  { %1546 = vmatprep.subr.mxu0 %v320_v59 }
  0x2b   :  { %1547 = vmatpush3.msra.mxu0 %v320_v59 }
  0x2c   :  { %1548 = vmatprep.subr.mxu0 %v319_v60 }
  0x2d   :  { %1549 = vmatpush3.msra.mxu0 %v319_v60 }
  0x2e   :  { %1550 = vmatprep.subr.mxu0 %v318_v61 }
  0x2f   :  { %1551 = vmatpush3.msra.mxu0 %v318_v61 }
  0x30   :  { %1552 = vmatprep.subr.mxu0 %v317_v62 }
  0x31   :  { %1553 = vmatpush3.msra.mxu0 %v317_v62 }
  0x32   :  { %1637 = vmatprep.subr.mxu0 %v1769_v36  ;;  %1555 = vmatmul.mubr.msk.f32.vlgmr.msra.gmra.mxu0 %vm242_vm2, %v399_v0 }
  0x33   :  { %1557 = vmatprep.mubr.msk.f32.mxu0 %vm242_vm2, %v400_v1 }
  0x36   :  { %1558 = vmatmul.mubr.msk.f32.gmra.mxu0 %vm242_vm2, %v401_v2 }
  0x37   :  { %1560 = vmatprep.mubr.msk.f32.mxu0 %vm242_vm2, %v402_v3 }
  0x3a   :  { %1561 = vmatmul.mubr.msk.f32.gmra.mxu0 %vm242_vm2, %v403_v4 }
  0x3b   :  { %1563 = vmatprep.mubr.msk.f32.mxu0 %vm242_vm2, %v404_v5 }
  0x3e   :  { %1564 = vmatmul.mubr.msk.f32.gmra.mxu0 %vm242_vm2, %v405_v6 }
  0x3f   :  { %1566 = vmatprep.mubr.msk.f32.mxu0 %vm242_vm2, %v406_v7 }
  0x42   :  { %1567 = vmatmul.mubr.msk.f32.gmra.mxu0 %vm242_vm2, %v407_v8 }
  0x43   :  { %1569 = vmatprep.mubr.msk.f32.mxu0 %vm242_vm2, %v408_v9 }
  0x46   :  { %1570 = vmatmul.mubr.msk.f32.gmra.mxu0 %vm242_vm2, %v409_v10 }
  0x47   :  { %1572 = vmatprep.mubr.msk.f32.mxu0 %vm242_vm2, %v410_v11 }
  0x4a   :  { %1573 = vmatmul.mubr.msk.f32.gmra.mxu0 %vm242_vm2, %v411_v12 }
  0x4b   :  { %1575 = vmatprep.mubr.msk.f32.mxu0 %vm242_vm2, %v412_v13 }
  0x4e   :  { %1576 = vmatmul.mubr.msk.f32.gmra.mxu0 %vm242_vm2, %v413_v14 }
  0x4f   :  { %1669 = vmatprep.mubr.msk.f32.mxu0 %vm1770_vm0, %v1769_v36 }
  0xe2   :  { %v1390_v37 = vpop.f32.mrf.mxu0 }
  0xe4   :  { %v1391_v38 = vpop.f32.mrf.mxu0 }
  0xe5   :  { %v1392_v41 = vadd.f32 %v1391_v38, %v1390_v37 }
  0xe6   :  { %v1393_v39 = vpop.f32.mrf.mxu0 }
  0xe7   :  { %v151_v45 = vadd.f32 %v1392_v41, %v1302_v43 }
  0xe8   :  { %v1394_v40 = vpop.f32.mrf.mxu0 }
  0xe9   :  { %v1395_v42 = vadd.f32 %v1394_v40, %v1393_v39 }
  0xeb   :  { %v156_v44 = vadd.f32 %v1395_v42, %v1302_v43 }
  0xed   :  { %1494 = vmatpush3.msra.mxu1 %v156_v44 }
  0xee   :  { %1495 = vmatprep.subr.mxu1 %v1769_v36 }
  0xef   :  { %1496 = vmatpush3.msra.mxu1 %v151_v45 }
  0xf0   :  { %1498 = vmatmul.mubr.msk.f32.vlgmr.msra.gmra.mxu1 %vm160_vm1, %v159_v46  ;;  %1500 = vmatprep.subr.mxu1 %v1769_v36 }
  0xf1   :  { %1501 = vmatpush3.msra.mxu1 %v241_v47  ;;  %1516 = vmatprep.mubr.msk.f32.mxu1 %vm1770_vm0, %v1769_v36 }
  0xf2   :  { %1502 = vmatprep.subr.mxu1 %v1769_v36  ;;  %v1556_v26 = vpop.f32.mrf.mxu0 }
  0xf3   :  { %1503 = vmatpush3.msra.mxu1 %v240_v48 }
  0xf4   :  { %1504 = vmatprep.subr.mxu1 %v1769_v36  ;;  %v528_v27 = vpop.f32.mrf.mxu0 }
  0xf5   :  { %1505 = vmatpush3.msra.mxu1 %v239_v49 }
  0xf6   :  { %1506 = vmatprep.subr.mxu1 %v1769_v36  ;;  %v1559_v30 = vpop.f32.mrf.mxu0 }
  0xf7   :  { %1507 = vmatpush3.msra.mxu1 %v238_v50 }
  0xf8   :  { %1508 = vmatprep.subr.mxu1 %v1769_v36  ;;  %v538_v31 = vpop.f32.mrf.mxu0 }
  0xf9   :  { %1509 = vmatpush3.msra.mxu1 %v237_v51 }
  0xfa   :  { %1510 = vmatprep.subr.mxu1 %v1769_v36  ;;  %v1562_v32 = vpop.f32.mrf.mxu0 }
  0xfb   :  { %1511 = vmatpush3.msra.mxu1 %v236_v52 }
  0xfc   :  { %1512 = vmatprep.subr.mxu1 %v1769_v36  ;;  %v548_v33 = vpop.f32.mrf.mxu0 }
  0xfd   :  { %1513 = vmatpush3.msra.mxu1 %v235_v53 }
  0xfe   :  { %1514 = vmatprep.subr.mxu1 %v1769_v36  ;;  %v1565_v37 = vpop.f32.mrf.mxu0 }
  0xff   :  { %1515 = vmatpush3.msra.mxu1 %v234_v54 }
 0x100   :  { %1519 = vmatprep.subr.mxu1 %v1769_v36  ;;  %v558_v38 = vpop.f32.mrf.mxu0 }
 0x102   :  { %v1568_v39 = vpop.f32.mrf.mxu0 }
 0x104   :  { %v568_v40 = vpop.f32.mrf.mxu0 }
 0x106   :  { %v1571_v41 = vpop.f32.mrf.mxu0 }
 0x108   :  { %v578_v42 = vpop.f32.mrf.mxu0 }
 0x10a   :  { %v1574_v43 = vpop.f32.mrf.mxu0 }
 0x10c   :  { %v588_v44 = vpop.f32.mrf.mxu0 }
 0x10e   :  { %v1577_v45 = vpop.f32.mrf.mxu0 }
 0x110   :  { %v598_v46 = vpop.f32.mrf.mxu0 }
 0x1b0   :  { %v230_v15 = vpop.f32.mrf.mxu1 }
 0x1b1   :  { %1517 = vmatmul.mubr.msk.f32.vlgmr.msra.gmra.mxu1 %vm242_vm2, %v230_v15 }
 0x1b2   :  { %1520 = vmatpush3.msra.mxu1 %v324_v55  ;;  %v1499_v16 = vpop.f32.mrf.mxu1  ;;  %1535 = vmatprep.mubr.msk.f32.mxu1 %vm1770_vm0, %v1769_v36 }
 0x1b3   :  { %1521 = vmatprep.subr.mxu1 %v1769_v36 }
 0x1b4   :  { %1522 = vmatpush3.msra.mxu1 %v323_v56 }
 0x1b5   :  { %1523 = vmatprep.subr.mxu1 %v1769_v36 }
 0x1b6   :  { %1524 = vmatpush3.msra.mxu1 %v322_v57 }
 0x1b7   :  { %1525 = vmatprep.subr.mxu1 %v1769_v36 }
 0x1b8   :  { %1526 = vmatpush3.msra.mxu1 %v321_v58 }
 0x1b9   :  { %1527 = vmatprep.subr.mxu1 %v1769_v36 }
 0x1ba   :  { %1528 = vmatpush3.msra.mxu1 %v320_v59 }
 0x1bb   :  { %1529 = vmatprep.subr.mxu1 %v1769_v36 }
 0x1bc   :  { %1530 = vmatpush3.msra.mxu1 %v319_v60 }
 0x1bd   :  { %1531 = vmatprep.subr.mxu1 %v1769_v36 }
 0x1be   :  { %1532 = vmatpush3.msra.mxu1 %v318_v61 }
 0x1bf   :  { %1533 = vmatprep.subr.mxu1 %v1769_v36 }
 0x1c0   :  { %1534 = vmatpush3.msra.mxu1 %v317_v62 }
 0x1c1   :  { %1536 = vmatmul.mubr.msk.f32.vlgmr.msra.gmra.mxu1 %vm242_vm2, %v316_v17  ;;  %1578 = vmatprep.subr.mxu1 %v1769_v36 }
 0x1c2   :  { %1594 = vmatprep.mubr.msk.f32.mxu1 %vm1770_vm0, %v1769_v36  ;;  %1579 = vmatpush3.msra.mxu1 %v614_v18 }
 0x1c3   :  { %1580 = vmatprep.subr.mxu1 %v1769_v36 }
 0x1c4   :  { %1581 = vmatpush3.msra.mxu1 %v613_v19 }
 0x1c5   :  { %1582 = vmatprep.subr.mxu1 %v1769_v36 }
 0x1c6   :  { %1583 = vmatpush3.msra.mxu1 %v612_v20 }
 0x1c7   :  { %1584 = vmatprep.subr.mxu1 %v1769_v36 }
 0x1c8   :  { %1585 = vmatpush3.msra.mxu1 %v611_v21 }
 0x1c9   :  { %1586 = vmatprep.subr.mxu1 %v1769_v36 }
 0x1ca   :  { %1587 = vmatpush3.msra.mxu1 %v610_v22 }
 0x1cb   :  { %1588 = vmatprep.subr.mxu1 %v1769_v36 }
 0x1cc   :  { %1589 = vmatpush3.msra.mxu1 %v609_v23 }
 0x1cd   :  { %1590 = vmatprep.subr.mxu1 %v1769_v36 }
 0x1ce   :  { %1591 = vmatpush3.msra.mxu1 %v608_v24 }
 0x1cf   :  { %1592 = vmatprep.subr.mxu1 %v1769_v36 }
 0x1d0   :  { %1593 = vmatpush3.msra.mxu1 %v607_v25 }
 0x1d1   :  { %1597 = vmatprep.subr.mxu1 %v614_v18 }
 0x271   :  { %v2125_v28 = vpop.f32.mrf.mxu1 }
 0x272   :  { %v881_v50 = vmul.f32 %v2125_v28, %v2125_v28 }
 0x273   :  { %v1518_v29 = vpop.f32.mrf.mxu1 }
 0x274   :  { %v883_v52 = vsel %vm882_vm3, %v881_v50, 0.0 }
 0x281   :  { %v394_v34 = vpop.f32.mrf.mxu1 }
 0x282   :  { %1595 = vmatmul.mubr.msk.f32.vlgmr.msra.gmra.mxu1 %vm242_vm2, %v394_v34 }
 0x283   :  { %1598 = vmatpush3.msra.mxu1 %v614_v18  ;;  %v1537_v35 = vpop.f32.mrf.mxu1  ;;  %1613 = vmatprep.mubr.msk.f32.mxu1 %vm242_vm2, %v528_v27 }
 0x284   :  { %1599 = vmatprep.subr.mxu1 %v613_v19 }
 0x285   :  { %1600 = vmatpush3.msra.mxu1 %v613_v19 }
 0x286   :  { %1601 = vmatprep.subr.mxu1 %v612_v20 }
 0x287   :  { %1602 = vmatpush3.msra.mxu1 %v612_v20 }
 0x288   :  { %1603 = vmatprep.subr.mxu1 %v611_v21 }
 0x289   :  { %1604 = vmatpush3.msra.mxu1 %v611_v21 }
 0x28a   :  { %1605 = vmatprep.subr.mxu1 %v610_v22 }
 0x28b   :  { %1606 = vmatpush3.msra.mxu1 %v610_v22 }
 0x28c   :  { %1607 = vmatprep.subr.mxu1 %v609_v23 }
 0x28d   :  { %1608 = vmatpush3.msra.mxu1 %v609_v23 }
 0x28e   :  { %1609 = vmatprep.subr.mxu1 %v608_v24 }
 0x28f   :  { %1610 = vmatpush3.msra.mxu1 %v608_v24 }
 0x290   :  { %1611 = vmatprep.subr.mxu1 %v607_v25 }
 0x291   :  { %1612 = vmatpush3.msra.mxu1 %v607_v25 }
 0x292   :  { %1614 = vmatmul.mubr.msk.f32.vlgmr.msra.gmra.mxu1 %vm242_vm2, %v1556_v26  ;;  %1672 = vmatprep.subr.mxu1 %v1769_v36 }
 0x293   :  { %1616 = vmatprep.mubr.msk.f32.mxu1 %vm242_vm2, %v538_v31 }
 0x296   :  { %1617 = vmatmul.mubr.msk.f32.gmra.mxu1 %vm242_vm2, %v1559_v30 }
 0x297   :  { %1619 = vmatprep.mubr.msk.f32.mxu1 %vm242_vm2, %v548_v33 }
 0x29a   :  { %1620 = vmatmul.mubr.msk.f32.gmra.mxu1 %vm242_vm2, %v1562_v32 }
 0x29b   :  { %1622 = vmatprep.mubr.msk.f32.mxu1 %vm242_vm2, %v558_v38 }
 0x29e   :  { %1623 = vmatmul.mubr.msk.f32.gmra.mxu1 %vm242_vm2, %v1565_v37 }
 0x29f   :  { %1625 = vmatprep.mubr.msk.f32.mxu1 %vm242_vm2, %v568_v40 }
 0x2a2   :  { %1626 = vmatmul.mubr.msk.f32.gmra.mxu1 %vm242_vm2, %v1568_v39 }
 0x2a3   :  { %1628 = vmatprep.mubr.msk.f32.mxu1 %vm242_vm2, %v578_v42 }
 0x2a6   :  { %1629 = vmatmul.mubr.msk.f32.gmra.mxu1 %vm242_vm2, %v1571_v41 }
 0x2a7   :  { %1631 = vmatprep.mubr.msk.f32.mxu1 %vm242_vm2, %v588_v44 }
 0x2aa   :  { %1632 = vmatmul.mubr.msk.f32.gmra.mxu1 %vm242_vm2, %v1574_v43 }
 0x2ab   :  { %1634 = vmatprep.mubr.msk.f32.mxu1 %vm242_vm2, %v598_v46  ;;  %v1009_v46 = vstv %s2302_s0  ;;  %s1771_s0 = smov [#allocation3]  }
 0x2ac   :  { %s1280_s20 = sshll.u32 %s1771_s0, 4  ;;  %s1281_s20 = int_to_ptr.vmem [resolvable:$true] %s1280_s20 }
 0x2ad   :  { %s1725_s21 = scalar_lea.vmem %s1281_s20, 64  ;;  %p1730_p1 = scmp.lt.s32.totalorder %s1281_s20, %s1281_s20 }
 0x2ae   :  { %1635 = vmatmul.mubr.msk.f32.gmra.mxu1 %vm242_vm2, %v1577_v45  ;;  %p1726_p0 = scmp.ne.s32.totalorder %s1281_s20, %s1725_s21  ;;  %p1731_p2 = scmp.lt.s32.totalorder %s1725_s21, %s1725_s21 }
 0x2af   :  { %1674 = vmatprep.mubr.msk.f32.mxu1 %vm1770_vm0, %v1769_v36 }
 0x2b0   :  { %p1732_p3 = por %p1731_p2, %p1730_p1 }
 0x2b2   :  { %p1733_p4 = pnand %p1732_p3, %p1726_p0 }
 0x342   :  { %v2147_v47 = vpop.f32.mrf.mxu1 }
 0x343   :  { %v889_v48 = vmul.f32 %v2147_v47, %v2147_v47 }
 0x344   :  { %v1596_v49 = vpop.f32.mrf.mxu1 }
 0x345   :  { %v890_v51 = vsel %vm882_vm3, %v889_v48, 0.0 }
 0x346   :  { %891 = vadd.xlane.f32.xlu0 %v890_v51 }
 0x34a   :  { %884 = vadd.xlane.f32.xlu0 %v883_v52 }
 0x352   :  { %v2153_v53 = vpop.f32.mrf.mxu1 }
 0x353   :  { %v897_v25 = vmul.f32 %v2153_v53, %v2153_v53 }
 0x354   :  { %v2155_v54 = vpop.f32.mrf.mxu1 }
 0x355   :  { %v916_v32 = vsel %vm912_vm4, %v897_v25, 0.0  ;;  %v896_v35 = vmul.f32 %v2155_v54, %v2155_v54 }
 0x356   :  { %v2157_v55 = vpop.f32.mrf.mxu1 }
 0x357   :  { %v899_v21 = vmul.f32 %v2157_v55, %v2157_v55  ;;  %v913_v38 = vsel %vm912_vm4, %v896_v35, 0.0 }
 0x358   :  { %v2159_v56 = vpop.f32.mrf.mxu1 }
 0x359   :  { %v922_v29 = vsel %vm912_vm4, %v899_v21, 0.0  ;;  %v898_v33 = vmul.f32 %v2159_v56, %v2159_v56 }
 0x35a   :  { %v2161_v57 = vpop.f32.mrf.mxu1 }
 0x35b   :  { %v901_v17 = vmul.f32 %v2161_v57, %v2161_v57  ;;  %v919_v37 = vsel %vm912_vm4, %v898_v33, 0.0 }
 0x35c   :  { %v2163_v58 = vpop.f32.mrf.mxu1 }
 0x35d   :  { %v928_v24 = vsel %vm912_vm4, %v901_v17, 0.0  ;;  %v900_v30 = vmul.f32 %v2163_v58, %v2163_v58 }
 0x35e   :  { %v2165_v59 = vpop.f32.mrf.mxu1 }
 0x35f   :  { %v903_v13 = vmul.f32 %v2165_v59, %v2165_v59  ;;  %v925_v34 = vsel %vm912_vm4, %v900_v30, 0.0 }
 0x360   :  { %v2167_v60 = vpop.f32.mrf.mxu1 }
 0x361   :  { %v934_v20 = vsel %vm912_vm4, %v903_v13, 0.0  ;;  %v902_v26 = vmul.f32 %v2167_v60, %v2167_v60 }
 0x362   :  { %v2169_v61 = vpop.f32.mrf.mxu1 }
 0x363   :  { %v905_v7 = vmul.f32 %v2169_v61, %v2169_v61  ;;  %v931_v31 = vsel %vm912_vm4, %v902_v26, 0.0 }
 0x364   :  { %v2171_v62 = vpop.f32.mrf.mxu1 }
 0x365   :  { %v940_v16 = vsel %vm912_vm4, %v905_v7, 0.0  ;;  %v904_v22 = vmul.f32 %v2171_v62, %v2171_v62 }
 0x366   :  { %v2173_v63 = vpop.f32.mrf.mxu1 }
 0x367   :  { %v907_v2 = vmul.f32 %v2173_v63, %v2173_v63  ;;  %v937_v27 = vsel %vm912_vm4, %v904_v22, 0.0 }
 0x368   :  { %v2175_v0 = vpop.f32.mrf.mxu1 }
 0x369   :  { %v946_v9 = vsel %vm912_vm4, %v907_v2, 0.0  ;;  %v906_v18 = vmul.f32 %v2175_v0, %v2175_v0 }
 0x36a   :  { %v2177_v1 = vpop.f32.mrf.mxu1 }
 0x36b   :  { %v909_v3 = vmul.f32 %v2177_v1, %v2177_v1  ;;  %v943_v23 = vsel %vm912_vm4, %v906_v18, 0.0 }
 0x36c   :  { %v2183_v4 = vpop.f32.mrf.mxu1 }
 0x36d   :  { %v952_v5 = vsel %vm912_vm4, %v909_v3, 0.0  ;;  %v908_v14 = vmul.f32 %v2183_v4, %v2183_v4 }
 0x36e   :  { %v2186_v6 = vpop.f32.mrf.mxu1  ;;  %953 = vadd.xlane.f32.xlu0 %v952_v5 }
 0x36f   :  { %v911_v8 = vmul.f32 %v2186_v6, %v2186_v6  ;;  %v949_v19 = vsel %vm912_vm4, %v908_v14, 0.0 }
 0x370   :  { %v2193_v10 = vpop.f32.mrf.mxu1 }
 0x371   :  { %v958_v11 = vsel %vm912_vm4, %v911_v8, 0.0  ;;  %v910_v12 = vmul.f32 %v2193_v10, %v2193_v10 }
 0x372   :  { %959 = vadd.xlane.f32.xlu1 %v958_v11  ;;  %947 = vadd.xlane.f32.xlu0 %v946_v9 }
 0x373   :  { %v955_v15 = vsel %vm912_vm4, %v910_v12, 0.0 }
 0x376   :  { %956 = vadd.xlane.f32.xlu1 %v955_v15  ;;  %941 = vadd.xlane.f32.xlu0 %v940_v16 }
 0x37a   :  { %950 = vadd.xlane.f32.xlu1 %v949_v19  ;;  %935 = vadd.xlane.f32.xlu0 %v934_v20 }
 0x37e   :  { %944 = vadd.xlane.f32.xlu1 %v943_v23  ;;  %929 = vadd.xlane.f32.xlu0 %v928_v24 }
 0x382   :  { %938 = vadd.xlane.f32.xlu1 %v937_v27  ;;  %923 = vadd.xlane.f32.xlu0 %v922_v29 }
 0x386   :  { %932 = vadd.xlane.f32.xlu1 %v931_v31  ;;  %917 = vadd.xlane.f32.xlu0 %v916_v32 }
 0x38a   :  { %926 = vadd.xlane.f32.xlu1 %v925_v34 }
 0x38e   :  { %920 = vadd.xlane.f32.xlu1 %v919_v37 }
 0x392   :  { %914 = vadd.xlane.f32.xlu1 %v913_v38 }
 0x3cf   :  { %v892_v39 = vpop.xlane.xlu0 %891 }
 0x3d0   :  { %v893_v40 = vmax.f32 %v892_v39, 1e-24 }
 0x3d2   :  { %1681 = vrsqrt.f32 %v893_v40 }
 0x3d3   :  { %v885_v41 = vpop.xlane.xlu0 %884 }
 0x3d4   :  { %v886_v42 = vmax.f32 %v885_v41, 1e-24 }
 0x3d6   :  { %1683 = vrsqrt.f32 %v886_v42 }
 0x3df   :  { %v1682_v43 = vpop.eup %1681 }
 0x3e0   :  { %v895_v44 = vmul.f32 %v1682_v43, %v2147_v47 }
 0x3e2   :  { %1673 = vmatpush3.xpose.msk.msra.mxu1 %vm912_vm4, %v895_v44 }
 0x3e3   :  { %v1684_v45 = vpop.eup %1683 }
 0x3e4   :  { %v888_v48 = vmul.f32 %v1684_v45, %v2125_v28 }
 0x3e6   :  { %v2239_v49 = vmul.f32 %v1009_v46, %v888_v48 }
 0x3e8   :  { %1675 = vmatmul.mubr.msk.f32.vlgmr.msra.gmra.mxu1 %vm912_vm4, %v2239_v49 }
 0x3f7   :  { %v954_v50 = vpop.xlane.xlu0 %953 }
 0x3f8   :  { %v974_v2 = vmax.f32 %v954_v50, 1e-24 }
 0x3fb   :  { %v960_v51 = vpop.xlane.xlu1 %959  ;;  %v948_v7 = vpop.xlane.xlu0 %947 }
 0x3fc   :  { %v976_v52 = vmax.f32 %v960_v51, 1e-24  ;;  %v972_v9 = vmax.f32 %v948_v7, 1e-24 }
 0x3fe   :  { %1685 = vrsqrt.f32 %v976_v52 }
 0x3ff   :  { %v957_v47 = vpop.xlane.xlu1 %956  ;;  %1687 = vrsqrt.f32 %v974_v2  ;;  %v942_v13 = vpop.xlane.xlu0 %941 }
 0x400   :  { %v975_v3 = vmax.f32 %v957_v47, 1e-24  ;;  %v970_v16 = vmax.f32 %v942_v13, 1e-24 }
 0x402   :  { %1689 = vrsqrt.f32 %v975_v3 }
 0x403   :  { %v951_v5 = vpop.xlane.xlu1 %950 }
 0x404   :  { %v973_v8 = vmax.f32 %v951_v5, 1e-24 }
 0x406   :  { %1691 = vrsqrt.f32 %v973_v8 }
 0x407   :  { %v945_v28 = vpop.xlane.xlu1 %944  ;;  %1693 = vrsqrt.f32 %v972_v9 }
 0x408   :  { %v971_v11 = vmax.f32 %v945_v28, 1e-24 }
 0x40a   :  { %1695 = vrsqrt.f32 %v971_v11 }
 0x40b   :  { %v1686_v12 = vpop.eup %1685  ;;  %v939_v18 = vpop.xlane.xlu1 %938  ;;  %1697 = vrsqrt.f32 %v970_v16 }
 0x40c   :  { %v1008_v14 = vmul.f32 %v1686_v12, %v2186_v6  ;;  %v1688_v15 = vpop.eup %1687  ;;  %v969_v21 = vmax.f32 %v939_v18, 1e-24  ;;  %v936_v6 = vpop.xlane.xlu0 %935 }
 0x40d   :  { %v1006_v20 = vmul.f32 %v1688_v15, %v2177_v1  ;;  %v968_v24 = vmax.f32 %v936_v6, 1e-24 }
 0x40e   :  { %1638 = vmatpush3.xpose.msk.msra.mxu0 %vm912_vm4, %v1008_v14  ;;  %1699 = vrsqrt.f32 %v969_v21 }
 0x40f   :  { %v1690_v17 = vpop.eup %1689  ;;  %1639 = vmatprep.subr.mxu0 %v1769_v36  ;;  %1701 = vrsqrt.f32 %v968_v24 }
 0x410   :  { %v1007_v19 = vmul.f32 %v1690_v17, %v2193_v10  ;;  %v933_v10 = vpop.xlane.xlu1 %932  ;;  %v930_v29 = vpop.xlane.xlu0 %929 }
 0x411   :  { %v967_v26 = vmax.f32 %v933_v10, 1e-24  ;;  %v966_v30 = vmax.f32 %v930_v29, 1e-24 }
 0x412   :  { %1640 = vmatpush3.xpose.msk.msra.mxu0 %vm912_vm4, %v1007_v19 }
 0x413   :  { %v1692_v22 = vpop.eup %1691  ;;  %1641 = vmatprep.subr.mxu0 %v1769_v36  ;;  %1703 = vrsqrt.f32 %v967_v26 }
 0x414   :  { %v1005_v23 = vmul.f32 %v1692_v22, %v2183_v4  ;;  %v1694_v25 = vpop.eup %1693  ;;  %v927_v32 = vpop.xlane.xlu1 %926  ;;  %1705 = vrsqrt.f32 %v966_v30 }
 0x415   :  { %v1004_v1 = vmul.f32 %v1694_v25, %v2173_v63  ;;  %v965_v33 = vmax.f32 %v927_v32, 1e-24  ;;  %v924_v35 = vpop.xlane.xlu0 %923 }
 0x416   :  { %1642 = vmatpush3.xpose.msk.msra.mxu0 %vm912_vm4, %v1006_v20  ;;  %v964_v37 = vmax.f32 %v924_v35, 1e-24 }
 0x417   :  { %1643 = vmatprep.subr.mxu0 %v1769_v36  ;;  %v1696_v27 = vpop.eup %1695  ;;  %1707 = vrsqrt.f32 %v965_v33 }
 0x418   :  { %v1003_v4 = vmul.f32 %v1696_v27, %v2175_v0  ;;  %v1698_v31 = vpop.eup %1697  ;;  %v921_v39 = vpop.xlane.xlu1 %920  ;;  %1709 = vrsqrt.f32 %v964_v37 }
 0x419   :  { %v1002_v63 = vmul.f32 %v1698_v31, %v2169_v61  ;;  %v963_v40 = vmax.f32 %v921_v39, 1e-24  ;;  %v918_v42 = vpop.xlane.xlu0 %917 }
 0x41a   :  { %1644 = vmatpush3.xpose.msk.msra.mxu0 %vm912_vm4, %v1005_v23  ;;  %v962_v44 = vmax.f32 %v918_v42, 1e-24 }
 0x41b   :  { %1645 = vmatprep.subr.mxu0 %v1769_v36  ;;  %v1700_v34 = vpop.eup %1699  ;;  %1711 = vrsqrt.f32 %v963_v40 }
 0x41c   :  { %v1001_v0 = vmul.f32 %v1700_v34, %v2171_v62  ;;  %v1702_v38 = vpop.eup %1701  ;;  %v915_v45 = vpop.xlane.xlu1 %914  ;;  %1713 = vrsqrt.f32 %v962_v44 }
 0x41d   :  { %v1000_v61 = vmul.f32 %v1702_v38, %v2165_v59  ;;  %v961_v48 = vmax.f32 %v915_v45, 1e-24 }
 0x41e   :  { %1646 = vmatpush3.xpose.msk.msra.mxu0 %vm912_vm4, %v1004_v1 }
 0x41f   :  { %1647 = vmatprep.subr.mxu0 %v1769_v36  ;;  %1715 = vrsqrt.f32 %v961_v48 }
 0x420   :  { %v1704_v41 = vpop.eup %1703 }
 0x421   :  { %v999_v62 = vmul.f32 %v1704_v41, %v2167_v60  ;;  %v1706_v43 = vpop.eup %1705 }
 0x422   :  { %1648 = vmatpush3.xpose.msk.msra.mxu0 %vm912_vm4, %v1003_v4  ;;  %v998_v46 = vmul.f32 %v1706_v43, %v2161_v57 }
 0x423   :  { %1649 = vmatprep.subr.mxu0 %v1769_v36 }
 0x424   :  { %v1708_v59 = vpop.eup %1707 }
 0x425   :  { %v997_v50 = vmul.f32 %v1708_v59, %v2163_v58  ;;  %v1710_v51 = vpop.eup %1709 }
 0x426   :  { %1650 = vmatpush3.xpose.msk.msra.mxu0 %vm912_vm4, %v1002_v63  ;;  %v996_v60 = vmul.f32 %v1710_v51, %v2157_v55 }
 0x427   :  { %1651 = vmatprep.subr.mxu0 %v1769_v36 }
 0x428   :  { %v1712_v52 = vpop.eup %1711 }
 0x429   :  { %v995_v57 = vmul.f32 %v1712_v52, %v2159_v56  ;;  %v1714_v2 = vpop.eup %1713  ;;  %v1206_v56 = vlaneseq }
 0x42a   :  { %1652 = vmatpush3.xpose.msk.msra.mxu0 %vm912_vm4, %v1001_v0  ;;  %v994_v58 = vmul.f32 %v1714_v2, %v2153_v53 }
 0x42b   :  { %1653 = vmatprep.subr.mxu0 %v1769_v36  ;;  %v1207_v3 = vshrl.u32 %v1206_v56, 7  ;;  %v1209_v5 = vand.u32 127, %v1206_v56 }
 0x42c   :  { %v1716_v47 = vpop.eup %1715 }
 0x42d   :  { %v993_v55 = vmul.f32 %v1716_v47, %v2155_v54  ;;  %vm1210_vm6 = vcmp.eq.s32.totalorder %v1207_v3, %v1209_v5 }
 0x42e   :  { %1654 = vmatpush3.xpose.msk.msra.mxu0 %vm912_vm4, %v1000_v61 }
 0x42f   :  { %1655 = vmatprep.subr.mxu0 %v1769_v36 }
 0x432   :  { %1656 = vmatpush3.xpose.msk.msra.mxu0 %vm912_vm4, %v999_v62 }
 0x433   :  { %1657 = vmatprep.subr.mxu0 %v1769_v36 }
 0x436   :  { %1658 = vmatpush3.xpose.msk.msra.mxu0 %vm912_vm4, %v998_v46 }
 0x437   :  { %1659 = vmatprep.subr.mxu0 %v1769_v36 }
 0x43a   :  { %1660 = vmatpush3.xpose.msk.msra.mxu0 %vm912_vm4, %v997_v50 }
 0x43b   :  { %1661 = vmatprep.subr.mxu0 %v1769_v36 }
 0x43e   :  { %1662 = vmatpush3.xpose.msk.msra.mxu0 %vm912_vm4, %v996_v60 }
 0x43f   :  { %1663 = vmatprep.subr.mxu0 %v1769_v36 }
 0x442   :  { %1664 = vmatpush3.xpose.msk.msra.mxu0 %vm912_vm4, %v995_v57 }
 0x443   :  { %1665 = vmatprep.subr.mxu0 %v1769_v36 }
 0x446   :  { %1666 = vmatpush3.xpose.msk.msra.mxu0 %vm912_vm4, %v994_v58 }
 0x447   :  { %1667 = vmatprep.subr.mxu0 %v1769_v36 }
 0x44a   :  { %1668 = vmatpush3.xpose.msk.msra.mxu0 %vm912_vm4, %v993_v55 }
 0x44d   :  { %1670 = vmatmul.mubr.msk.f32.vlgmr.msra.gmra.mxu0 %vm912_vm4, %v2239_v49 }
 0x4a8   :  { %v1202_v7 = vpop.f32.mrf.mxu1 }
 0x4a9   :  { %v1213_v53 = vsel %vm1212_vm5, %v1202_v7, -inf  ;;  %v1211_v28 = vsel %vm1210_vm6, %v1202_v7, 0.0 }
 0x4aa   :  { %1214 = vmax.xlane.f32.xlu0 %v1213_v53  ;;  %v1225_v8 = vrot.slane %v1213_v53, 4  ;;  %v1676_v9 = vpop.f32.mrf.mxu1  ;;  %v1244_v54 = vsel %vm1212_vm5, %v1211_v28, 0.0 }
 0x4ab   :  { %v1247_v22 = vrot.slane %v1244_v54, 4 }
 0x4ac   :  { %v1226_v36 = vmax.f32 %v1213_v53, %v1225_v8 }
 0x4ad   :  { %v1248_v24 = vadd.f32 %v1247_v22, %v1244_v54 }
 0x4ae   :  { %v1227_v11 = vrot.slane %v1226_v36, 2  ;;  %1245 = vadd.xlane.f32.xlu0 %v1244_v54 }
 0x4af   :  { %v1249_v25 = vrot.slane %v1248_v24, 2 }
 0x4b0   :  { %v1228_v12 = vmax.f32 %v1226_v36, %v1227_v11 }
 0x4b1   :  { %v1250_v10 = vadd.f32 %v1249_v25, %v1248_v24 }
 0x4b2   :  { %v1229_v13 = vrot.slane %v1228_v12, 1 }
 0x4b3   :  { %v1251_v1 = vrot.slane %v1250_v10, 1 }
 0x4b4   :  { %v1230_v49 = vmax.f32 %v1228_v12, %v1229_v13 }
 0x4b5   :  { %v1252_v4 = vadd.f32 %v1251_v1, %v1250_v10 }
 0x4b6   :  { %v1231_v14 = vsub.f32 %v1202_v7, %v1230_v49 }
 0x4b8   :  { %v1232_v15 = vmul.f32 1.442695, %v1231_v14 }
 0x4ba   :  { %1717 = vpow2.f32 %v1232_v15 }
 0x4c7   :  { %v1718_v16 = vpop.eup %1717 }
 0x4c8   :  { %v1234_v17 = vsel %vm1212_vm5, %v1718_v16, 0.0 }
 0x4c9   :  { %v1235_v18 = vrot.slane %v1234_v17, 4 }
 0x4cb   :  { %v1236_v19 = vadd.f32 %v1235_v18, %v1234_v17 }
 0x4cd   :  { %v1237_v20 = vrot.slane %v1236_v19, 2 }
 0x4cf   :  { %v1238_v21 = vadd.f32 %v1237_v20, %v1236_v19 }
 0x4d1   :  { %v1239_v6 = vrot.slane %v1238_v21, 1 }
 0x4d3   :  { %v1240_v23 = vadd.f32 %v1239_v6, %v1238_v21 }
 0x4d5   :  { %1719 = vlog2.f32 %v1240_v23 }
 0x4e2   :  { %v1720_v26 = vpop.eup %1719 }
 0x4e3   :  { %v1242_v27 = vmul.f32 0.6931472, %v1720_v26 }
 0x4e5   :  { %v1243_v29 = vadd.f32 %v1242_v27, %v1230_v49 }
 0x4e7   :  { %v1254_v30 = vsub.f32 %v1243_v29, %v1252_v4 }
 0x4e9   :  { %v1266_v37 = vsel %vm1265_vm7, %v1254_v30, 0.0 }
 0x50d   :  { %v1128_v31 = vpop.f32.mrf.mxu0 }
 0x50e   :  { %1132 = vst [vmem:[#allocation3] sm:$0xf] %v1128_v31 }
 0x50f   :  { %v1671_v32 = vpop.f32.mrf.mxu0 }
 0x533   :  { %v1215_v63 = vpop.xlane.xlu0 %1214 }
 0x534   :  { %v1216_v33 = vsub.f32 %v1202_v7, %v1215_v63 }
 0x536   :  { %v1217_v34 = vmul.f32 1.442695, %v1216_v33 }
 0x538   :  { %1721 = vpow2.f32 %v1217_v34 }
 0x545   :  { %v1722_v35 = vpop.eup %1721 }
 0x546   :  { %v1219_v0 = vsel %vm1212_vm5, %v1722_v35, 0.0 }
 0x547   :  { %1220 = vadd.xlane.f32.xlu1 %v1219_v0 }
 0x54b   :  { %1267 = vadd.xlane.f32.xlu1 %v1266_v37 }
 0x54c   :  { %1736 = shalt.err (!%p1733_p4)
}
 0x54d   :  { %1283 = dma.vmem_to_hbm [thread:$0]  %s1281_s20, 64, %s2312_s10, [#allocation4]   ;;  %v1246_v41 = vpop.xlane.xlu0 %1245  ;;  %vm1255_vm8 = vcmask 1043456   ;;  %vm1272_vm9 = vcmask 0  }
 0x54e   :  { %s1772_s24 = smov [#allocation5]  }
 0x54f   :  { %s1290_s10 = sshll.u32 %s1772_s24, 4  ;;  %s1291_s10 = int_to_ptr.vmem [resolvable:$true] %s1290_s10 }
 0x550   :  { %s1745_s25 = scalar_lea.vmem %s1291_s10, 16  ;;  %s1749_s26 = scalar_lea.vmem %s1291_s10, 32 }
 0x551   :  { %p1746_p5 = scmp.ne.s32.totalorder %s1291_s10, %s1745_s25  ;;  %p1750_p6 = scmp.lt.s32.totalorder %s1291_s10, %s1291_s10 }
 0x552   :  { %p1751_p7 = scmp.lt.s32.totalorder %s1749_s26, %s1745_s25 }
 0x554   :  { %p1752_p8 = por %p1751_p7, %p1750_p6 }
 0x556   :  { %p1753_p9 = pnand %p1752_p8, %p1746_p5 }
 0x5d0   :  { %v1221_v38 = vpop.xlane.xlu1 %1220 }
 0x5d1   :  { %1723 = vlog2.f32 %v1221_v38 }
 0x5d4   :  { %v1268_v48 = vpop.xlane.xlu1 %1267 }
 0x5d5   :  { %v1269_v60 = vmul.f32 0.25, %v1268_v48 }
 0x5de   :  { %v1724_v39 = vpop.eup %1723 }
 0x5df   :  { %v1223_v61 = vmul.f32 0.6931472, %v1724_v39 }
 0x5e1   :  { %v1224_v40 = vadd.f32 %v1223_v61, %v1215_v63 }
 0x5e3   :  { %v1253_v42 = vsub.f32 %v1224_v40, %v1246_v41 }
 0x5e5   :  { %v1256_v62 = vsel %vm1255_vm8, %v1253_v42, 0.0 }
 0x5e6   :  { %v1257_v43 = vrot.slane %v1256_v62, 4 }
 0x5e8   :  { %v1258_v44 = vadd.f32 %v1257_v43, %v1256_v62 }
 0x5ea   :  { %v1259_v45 = vrot.slane %v1258_v44, 2 }
 0x5ec   :  { %v1260_v46 = vadd.f32 %v1259_v45, %v1258_v44 }
 0x5ee   :  { %v1261_v59 = vrot.slane %v1260_v46, 1 }
 0x5f0   :  { %v1262_v50 = vadd.f32 %v1261_v59, %v1260_v46 }
 0x5f2   :  { %v1264_v51 = vmul.f32 0.25, %v1262_v50 }
 0x5f4   :  { %v1270_v52 = vadd.f32 %v1269_v60, %v1264_v51 }
 0x5f6   :  { %v1271_v57 = vmul.f32 0.5, %v1270_v52 }
 0x5f8   :  { %1273 = vst.msk [vmem:[#allocation5] sm:$0x1] %vm1272_vm9, %v1271_v57 }
 0x5f9   :  { %1756 = shalt.err (!%p1753_p9)
}
 0x5fa   :  { %1293 = dma.vmem_to_hbm [thread:$0]  %s1291_s10, 16, %s2313_s11, [#allocation6]  }
 0x5fb   :  { %1765 = dma.done.wait [#allocation4], 64  }
 0x5fc   :  { %1766 = vsyncadd [#allocation4], 4294967232 }
 0x5fd   :  { %1767 = dma.done.wait [#allocation6], 16  }
 0x5fe   :  { %1768 = vsyncadd [#allocation6], 4294967280 }
 0x5ff   :  { %1300 = vsyncpa [#allocation4], 1 }
 0x600   :  { %1301 = vsyncpa [#allocation6], 1 }

</bundles_post_ra>
